<compile_context>
chip_gen: v6e
topology: v6e:2x2x1
jax: 0.10.0
libtpu: 0.0.40
codegen_flags: <defaults>
</compile_context>

<pallas_src>
import jax
import jax.numpy as jnp
from jax.experimental import pallas as pl
from jax.experimental.pallas import tpu as pltpu


def image_extractor_kernel(w_ref, p_ref, o_ref):
    # w_ref: [O, 9*C]    conv-equivalent weight, pre-flattened to matmul layout
    # p_ref: [9*C, H*W]  im2col patches (pixel index on the lane axis)
    # o_ref: [O, H*W]
    y = jnp.dot(w_ref[...], p_ref[...], preferred_element_type=jnp.float32)
    o_ref[...] = jnp.tanh(y)   # EUP


@jax.jit
def image_extractor(x, wt):
    """x: [C, H, W], wt: ConvTranspose2d weight [C, O, 3, 3] -> out [O, H, W]."""
    C, H, W = x.shape
    O, K = wt.shape[1], wt.shape[2]
    assert K == 3, "kernel_size=3 expected"

    x = x.astype(jnp.float32)
    wt = wt.astype(jnp.float32)

    # ConvTranspose2d(s=1, p=1) == Conv2d(p=1) with flipped kernel and swapped
    # channel axes:  w_conv[o, i, kh, kw] = wt[i, o, 2-kh, 2-kw].
    # Flatten directly into the matmul layout [O, (kh, kw, i)].
    w_flat = jnp.transpose(wt[:, :, ::-1, ::-1], (1, 2, 3, 0)).reshape(O, K * K * C)

    # im2col in the same jit (layout plumbing, no FLOPs): patches[(kh,kw,i),(h,w)].
    x_pad = jnp.pad(x, ((0, 0), (1, 1), (1, 1)))
    patches = jnp.stack(
        [x_pad[:, kh:kh + H, kw:kw + W] for kh in range(K) for kw in range(K)],
        axis=0,
    ).reshape(K * K * C, H * W)

    vmem = pl.BlockSpec(memory_space=pltpu.MemorySpace.VMEM)
    out = pl.pallas_call(
        image_extractor_kernel,
        out_shape=jax.ShapeDtypeStruct((O, H * W), jnp.float32),
        in_specs=[vmem, vmem],
        out_specs=vmem,
    )(w_flat, patches)

    return out.reshape(O, H, W)


def reference_forward(x, wt):
    """Pure-JAX replica of ConvTranspose2d(k=3, s=1, p=1, bias=False) + Tanh,
    written directly from the transposed-conv scatter definition (independent
    of the conv-equivalence used in the kernel)."""
    C, H, W = x.shape
    O = wt.shape[1]
    full = jnp.zeros((O, H + 2, W + 2), jnp.float32)
    for kh in range(3):
        for kw in range(3):
            contrib = jnp.einsum('chw,co->ohw', x, wt[:, :, kh, kw])
            full = full.at[:, kh:kh + H, kw:kw + W].add(contrib)
    out = full[:, 1:1 + H, 1:1 + W]   # padding=1 crops one ring
    return jnp.tanh(out)


if __name__ == "__main__":
    in_chans = 4
    out_chans = 3
    H = W = 16

    key = jax.random.PRNGKey(0)
    kx, kw = jax.random.split(key)
    x = jax.random.normal(kx, (in_chans, H, W), jnp.float32)
    # PyTorch ConvTranspose2d weight layout: [in_chans, out_chans, kH, kW]
    wt = jax.random.normal(kw, (in_chans, out_chans, 3, 3), jnp.float32) * 0.2

    out = image_extractor(x, wt)
    out = jax.block_until_ready(out)

    ref = reference_forward(x, wt)
    assert out.shape == (out_chans, H, W), (out.shape, (out_chans, H, W))
    assert jnp.allclose(out, ref, atol=2e-4, rtol=2e-4), \
        float(jnp.max(jnp.abs(out - ref)))

    print("KERNEL_OK")
</pallas_src>

<mosaic_0001>
module attributes {stable_mosaic.version = 11 : i64} {
  func.func @image_extractor_kernel(%arg0: memref<3x36xf32, #tpu.memory_space<vmem>>, %arg1: memref<36x256xf32, #tpu.memory_space<vmem>>, %arg2: memref<3x256xf32, #tpu.memory_space<vmem>>) attributes {dimension_semantics = [], scalar_prefetch = 0 : i64, scratch_operands = 0 : i64, tpu.core_type = #tpu.core_type<tc>} {
    %c0 = arith.constant 0 : index
    %c0_0 = arith.constant 0 : index
    %0 = vector.load %arg0[%c0, %c0_0] : memref<3x36xf32, #tpu.memory_space<vmem>>, vector<3x36xf32>
    %c0_1 = arith.constant 0 : index
    %c0_2 = arith.constant 0 : index
    %1 = vector.load %arg1[%c0_1, %c0_2] : memref<36x256xf32, #tpu.memory_space<vmem>>, vector<36x256xf32>
    %cst = arith.constant dense<0.000000e+00> : vector<3x256xf32>
    %2 = tpu.matmul %0, %1, %cst {dimension_numbers = #tpu.dot_dimension_numbers<[1], [0], [0], [1], [0, 0, 1, 1], [], []>} : vector<3x36xf32>, vector<36x256xf32>, vector<3x256xf32> -> vector<3x256xf32>
    %3 = math.tanh %2 : vector<3x256xf32>
    %c0_3 = arith.constant 0 : index
    %c0_4 = arith.constant 0 : index
    %4 = vector.load %arg2[%c0_3, %c0_4] : memref<3x256xf32, #tpu.memory_space<vmem>>, vector<3x256xf32>
    tpu.vector_store %arg2[%c0_3, %c0_4], %3 {strides = array<i32>} : memref<3x256xf32, #tpu.memory_space<vmem>>, vector<3x256xf32>,
    return
  }
}

</mosaic_0001>

<bundles_post_ra>
// kernel: image_extractor.1
= control target key start
LH: loop header
LB: loop body
LE: loop exit
PB: predicated region body
PF: predicated region fallthrough
CT: control target
= control target key end

     0   :  { %vm26_vm0 = vcmask 1043456   ;;  %v123_v3 = vmov 0.0   ;;  %vm22_vm1 = vcmask 293888   ;;  %s175_s1 = inlined_call_operand.vmem [shape: f32[36,256], index: 1, kind: input, shape index: {}]   ;;  %s176_s0 = inlined_call_operand.vmem [shape: f32[3,36], index: 0, kind: input, shape index: {}]   ;;  %s177_s2 = inlined_call_operand.vmem [shape: f32[3,256], index: 2, kind: output, shape index: {}]  }
   0x1   :  { %v21_v0 = vld [vmem:[%s175_s1 + $0x48] sm:$0xf]  ;;  %v20_v1 = vld [vmem:[%s175_s1 + $0x40] sm:$0xf]  ;;  %v19_v2 = vld [vmem:[%s175_s1 + $0x38] sm:$0xff]  ;;  %97 = vmatprep.mubr.f32.mxu0 %v123_v3 }
   0x2   :  { %115 = vmatprep.subr.msk.mxu0 %vm26_vm0, %v21_v0  ;;  %v18_v4 = vld [vmem:[%s175_s1 + $0x30] sm:$0xff]  ;;  %v17_v5 = vld [vmem:[%s175_s1 + $0x28] sm:$0xff]  ;;  %v16_v6 = vld [vmem:[%s175_s1 + $0x20] sm:$0xff] }
   0x3   :  { %116 = vmatpush1.msk.msra.mxu0 %vm26_vm0, %v20_v1  ;;  %v15_v7 = vld [vmem:[%s175_s1 + $0x18] sm:$0xff]  ;;  %v14_v8 = vld [vmem:[%s175_s1 + $0x10] sm:$0xff]  ;;  %v13_v9 = vld [vmem:[%s175_s1 + $0x8] sm:$0xff] }
   0x4   :  { %57 = vmatprep.subr.mxu0 %v19_v2  ;;  %v12_v10 = vld [vmem:[%s175_s1] sm:$0xff] }
   0x5   :  { %58 = vmatpush1.msra.mxu0 %v18_v4  ;;  %v11_v11 = vld [vmem:[%s176_s0] sm:$0x7] }
   0x6   :  { %59 = vmatprep.subr.mxu0 %v17_v5 }
   0x7   :  { %60 = vmatpush1.msra.mxu0 %v16_v6 }
   0x8   :  { %61 = vmatprep.subr.mxu0 %v15_v7 }
   0x9   :  { %62 = vmatpush1.msra.mxu0 %v14_v8 }
   0xa   :  { %63 = vmatprep.subr.mxu0 %v13_v9 }
   0xb   :  { %64 = vmatpush1.msra.mxu0 %v12_v10 }
   0xc   :  { %117 = vmatmul.mubr.msk.f32.vlgmr.msra.gmra.mxu0 %vm22_vm1, %v11_v11 }
  0xcc   :  { %v99_v12 = vpop.f32.mrf.mxu0 }
  0xcd   :  { %119 = vtanh.f32 %v99_v12 }
  0xce   :  { %v101_v13 = vpop.f32.mrf.mxu0 }
  0xcf   :  { %121 = vtanh.f32 %v101_v13 }
  0xda   :  { %v120_v14 = vpop.eup %119 }
  0xdc   :  { %v122_v15 = vpop.eup %121 }
  0xdd   :  { %v108_v16 = vcombine.low %v120_v14, %v122_v15 }
  0xdf   :  { %110 = vst [vmem:[%s177_s2] sm:$0x77] %v108_v16 }

</bundles_post_ra>
